<compile_context>
chip_gen: v7x
topology: tpu7x:2x2x1
jax: 0.10.0
libtpu: 0.0.40
codegen_flags: <defaults>
</compile_context>

<pallas_src>
import functools

import jax
import jax.numpy as jnp
from jax import lax
from jax.experimental import pallas as pl
from jax.experimental.pallas import tpu as pltpu

_ROW_ALIGN = {4: 8, 2: 16, 1: 32}  # sublane packing per dtype itemsize


def _round_up(x, m):
    return ((x + m - 1) // m) * m


def _l2norm_kernel(x_ref, o_ref, *, eps):
    # Each invocation sees a (rows, D) block with the feature axis fully resident.
    x = x_ref[...].astype(jnp.float32)
    sq_sum = jnp.sum(x * x, axis=-1, keepdims=True)          # (rows, 1)
    # 1 / max(sqrt(s), eps) == rsqrt(max(s, eps^2))  (s >= 0); EUP slot, ~free.
    inv = lax.rsqrt(jnp.maximum(sq_sum, eps * eps))
    o_ref[...] = (x * inv).astype(o_ref.dtype)


def _l2_normalize_2d(x, *, eps=1e-12,
                     block_bytes_budget=4 << 20,       # ~4 MiB per block
                     single_block_max_bytes=256 << 10,  # <=256 KiB -> one block
                     vmem_limit_bytes=48 << 20):
    """L2-normalize along the last axis of a 2-D array (N, D)."""
    N, D = x.shape
    dtype = x.dtype
    itemsize = jnp.dtype(dtype).itemsize
    row_align = _ROW_ALIGN.get(itemsize, 8)

    kernel = functools.partial(_l2norm_kernel, eps=float(eps))
    row_bytes = D * itemsize
    total_bytes = N * row_bytes

    # Guard: extremely wide feature dims can't fit even a minimal row tile in
    # VMEM (binds first on v7x's 64 MiB physical VMEM).
    # TODO(synk): feature-chunked two-pass reduction for very wide D instead of
    # this plain-JAX fallback.
    if row_align * row_bytes > (8 << 20):
        xf = x.astype(jnp.float32)
        inv = lax.rsqrt(
            jnp.maximum(jnp.sum(xf * xf, axis=-1, keepdims=True), eps * eps))
        return (xf * inv).astype(dtype)

    if total_bytes <= single_block_max_bytes or N < 2 * row_align:
        # Small input: whole array as one block, no grid / pipeline overhead.
        return pl.pallas_call(
            kernel,
            out_shape=jax.ShapeDtypeStruct((N, D), dtype),
        )(x)

    # Grid path: large row tiles sized from the byte budget (no fixed row cap).
    tile_n = max(row_align, block_bytes_budget // max(row_bytes, 1))
    tile_n = (tile_n // row_align) * row_align
    tile_n = min(tile_n, _round_up(N, row_align))
    # At least 2 grid steps so both TensorCores (v7x megacore) get work.
    if pl.cdiv(N, tile_n) < 2:
        tile_n = max(row_align, _round_up(pl.cdiv(N, 2), row_align))

    grid = (pl.cdiv(N, tile_n),)  # partial last block; no row pad, no slice.
    return pl.pallas_call(
        kernel,
        out_shape=jax.ShapeDtypeStruct((N, D), dtype),
        grid=grid,
        # Last block dim equals the full array D (unpadded): masked tail stores
        # are far cheaper than pad + column-slice HBM passes.
        in_specs=[pl.BlockSpec((tile_n, D), lambda i: (i, 0))],
        out_specs=pl.BlockSpec((tile_n, D), lambda i: (i, 0)),
        compiler_params=pltpu.CompilerParams(
            dimension_semantics=("parallel",),
            vmem_limit_bytes=vmem_limit_bytes,
        ),
    )(x)


def l2_normalize(x, *, dim=1, eps=1e-12):
    """Mirror of L2NormalizationLayer(dim, eps).forward for any-rank input."""
    dim = dim % x.ndim
    # For the GraphSAGE case (2-D, dim=1) and any minor-most dim this moveaxis
    # is a no-op; only non-minor dims of >2-D inputs pay a real transpose.
    x_moved = jnp.moveaxis(x, dim, -1)
    lead = x_moved.shape[:-1]
    D = x_moved.shape[-1]
    out2 = _l2_normalize_2d(x_moved.reshape(-1, D), eps=eps)
    out = out2.reshape(*lead, D)
    return jnp.moveaxis(out, -1, dim)


class L2NormalizationLayer:
    """JAX/Pallas port of the PyTorch module."""

    def __init__(self, dim=1, eps=1e-12):
        self.dim = dim
        self.eps = eps

    def __call__(self, x):
        return l2_normalize(x, dim=self.dim, eps=self.eps)


def _ref_normalize(x, dim, eps):
    norm = jnp.sqrt(jnp.sum(x.astype(jnp.float32) ** 2, axis=dim, keepdims=True))
    return (x.astype(jnp.float32) / jnp.maximum(norm, eps)).astype(x.dtype)


if __name__ == "__main__":
    key = jax.random.PRNGKey(0)
    layer = L2NormalizationLayer(dim=1, eps=1e-12)
    k1, k2, k3 = jax.random.split(key, 3)

    # 1) GraphSAGE-like small case: 64 nodes x 128 feats (single-block path).
    x1 = jax.random.normal(k1, (64, 128), dtype=jnp.float32)
    out1 = jax.block_until_ready(layer(x1))
    ref1 = _ref_normalize(x1, 1, 1e-12)
    assert out1.shape == x1.shape and out1.dtype == x1.dtype
    assert jnp.allclose(out1, ref1, atol=1e-6, rtol=1e-6)

    # 2) Non-lane-aligned feature dim, single-block path (no pad, no slice).
    x2 = jax.random.normal(k2, (40, 200), dtype=jnp.float32)
    out2 = jax.block_until_ready(layer(x2))
    ref2 = _ref_normalize(x2, 1, 1e-12)
    assert jnp.allclose(out2, ref2, atol=1e-6, rtol=1e-6)

    # 3) Grid path: >=2 parallel row blocks with a PARTIAL last block and a
    #    non-128-multiple feature dim (exercises masked tail stores).
    x3 = jax.random.normal(k3, (2072, 200), dtype=jnp.float32)
    out3 = jax.block_until_ready(layer(x3))
    ref3 = _ref_normalize(x3, 1, 1e-12)
    assert jnp.allclose(out3, ref3, atol=1e-6, rtol=1e-6)

    print("KERNEL_OK")
</pallas_src>

<mosaic_0001>
module attributes {stable_mosaic.version = 11 : i64} {
  func.func @_l2norm_kernel(%arg0: memref<64x128xf32, #tpu.memory_space<vmem>>, %arg1: memref<64x128xf32, #tpu.memory_space<vmem>>) attributes {dimension_semantics = [], scalar_prefetch = 0 : i64, scratch_operands = 0 : i64, tpu.core_type = #tpu.core_type<tc>} {
    %c0 = arith.constant 0 : index
    %c0_0 = arith.constant 0 : index
    %0 = vector.load %arg0[%c0, %c0_0] : memref<64x128xf32, #tpu.memory_space<vmem>>, vector<64x128xf32>
    %1 = arith.mulf %0, %0 : vector<64x128xf32>
    %cst = arith.constant dense<0.000000e+00> : vector<64xf32>
    %2 = vector.multi_reduction <add>, %1, %cst [1] : vector<64x128xf32> to vector<64xf32>
    %3 = vector.shape_cast %2 : vector<64xf32> to vector<64x1xf32>
    %cst_1 = arith.constant 1.000000e-24 : f32
    %4 = vector.broadcast %cst_1 : f32 to vector<64x1xf32>
    %5 = arith.maximumf %3, %4 : vector<64x1xf32>
    %6 = math.rsqrt %5 : vector<64x1xf32>
    %7 = vector.broadcast %6 : vector<64x1xf32> to vector<64x128xf32>
    %8 = arith.mulf %0, %7 : vector<64x128xf32>
    %c0_2 = arith.constant 0 : index
    %c0_3 = arith.constant 0 : index
    %9 = vector.load %arg1[%c0_2, %c0_3] : memref<64x128xf32, #tpu.memory_space<vmem>>, vector<64x128xf32>
    tpu.vector_store %arg1[%c0_2, %c0_3], %8 {strides = array<i32>} : memref<64x128xf32, #tpu.memory_space<vmem>>, vector<64x128xf32>,
    return
  }
}

</mosaic_0001>

<bundles_post_ra>
// kernel: tpu_custom_call.1
= control target key start
LH: loop header
LB: loop body
LE: loop exit
PB: predicated region body
PF: predicated region fallthrough
CT: control target
= control target key end

     0   :  { %6 = vsyncpa [#allocation3], 0  ;;  %s216_s0 = inlined_call_operand.hbm [shape: f32[64,128], index: 0, kind: input, shape index: {}]   ;;  %s217_s1 = inlined_call_operand.hbm [shape: f32[64,128], index: 1, kind: output, shape index: {}]  }
   0x1   :  { %7 = vsyncpa [#allocation4], 0  ;;  %s172_s6 = smov [#allocation2]   ;;  %s124_s10 = scalar_lea.hbm %s216_s0, 1024 }
   0x2   :  { %s13_s7 = sshll.u32 %s172_s6, 4  ;;  %p125_p0 = scmp.ne.s32.totalorder %s216_s0, %s124_s10  ;;  %s14_s7 = int_to_ptr.vmem [resolvable:$true] %s13_s7 }
   0x3   :  { %p128_p1 = scmp.lt.u32.totalorder %s124_s10, %s216_s0 }
   0x5   :  { %p130_p2 = pnand %p128_p1, %p125_p0 }
   0x7   :  { %133 = shalt.err (!%p130_p2)
}
   0x8   :  { %s134_s15 = scalar_lea.vmem %s14_s7, 1024  ;;  %p139_p4 = scmp.lt.s32.totalorder %s14_s7, %s14_s7 }
   0x9   :  { %p135_p3 = scmp.ne.s32.totalorder %s14_s7, %s134_s15  ;;  %p140_p5 = scmp.lt.s32.totalorder %s134_s15, %s134_s15 }
   0xb   :  { %p141_p6 = por %p140_p5, %p139_p4 }
   0xd   :  { %p142_p7 = pnand %p141_p6, %p135_p3 }
   0xf   :  { %145 = shalt.err (!%p142_p7)
}
  0x10   :  { %s173_s16 = smov 128   ;;  %s174_s17 = smov 8  }
  0x11   :  { %19 = dma.hbm_to_vmem [thread:$0]  %s216_s0, 1024, %s14_s7, [#allocation3], %s173_s16, %s173_s16, %s174_s17  }
  0x12   :  { %168 = dma.done.wait [#allocation3], 1024  }
  0x13   :  { %169 = vsyncadd [#allocation3], 4294966272  ;;  %v25_v0 = vld [vmem:[#allocation2 + $0x10] sm:$0xff]  ;;  %v23_v1 = vld [vmem:[#allocation2] sm:$0xff]  ;;  %s175_s0 = smov [#allocation5]  }
  0x14   :  { %v26_v2 = vld [vmem:[#allocation2 + $0x18] sm:$0xff]  ;;  %v33_v3 = vmul.f32 %v25_v0, %v25_v0  ;;  %v31_v4 = vmul.f32 %v23_v1, %v23_v1  ;;  %v24_v5 = vld [vmem:[#allocation2 + $0x8] sm:$0xff]  ;;  %v27_v9 = vld [vmem:[#allocation2 + $0x20] sm:$0xff]  ;;  %s92_s20 = sshll.u32 %s175_s0, 4  ;;  %s93_s20 = int_to_ptr.vmem [resolvable:$true] %s92_s20 }
  0x15   :  { %v34_v6 = vmul.f32 %v26_v2, %v26_v2  ;;  %v32_v7 = vmul.f32 %v24_v5, %v24_v5  ;;  %v28_v8 = vld [vmem:[#allocation2 + $0x28] sm:$0xff]  ;;  %v35_v11 = vmul.f32 %v27_v9, %v27_v9  ;;  %v30_v12 = vld [vmem:[#allocation2 + $0x38] sm:$0xff]  ;;  %v29_v13 = vld [vmem:[#allocation2 + $0x30] sm:$0xff]  ;;  %s146_s21 = scalar_lea.vmem %s93_s20, 1024  ;;  %p151_p9 = scmp.lt.s32.totalorder %s93_s20, %s93_s20 }
  0x16   :  { %43 = vadd.xlane.f32.xlu1 %v33_v3  ;;  %39 = vadd.xlane.f32.xlu0 %v31_v4  ;;  %v36_v10 = vmul.f32 %v28_v8, %v28_v8  ;;  %v38_v14 = vmul.f32 %v30_v12, %v30_v12  ;;  %v37_v15 = vmul.f32 %v29_v13, %v29_v13  ;;  %p147_p8 = scmp.ne.s32.totalorder %s93_s20, %s146_s21  ;;  %p152_p10 = scmp.lt.s32.totalorder %s146_s21, %s146_s21 }
  0x18   :  { %p153_p11 = por %p152_p10, %p151_p9 }
  0x1a   :  { %45 = vadd.xlane.f32.xlu1 %v34_v6  ;;  %41 = vadd.xlane.f32.xlu0 %v32_v7  ;;  %p154_p12 = pnand %p153_p11, %p147_p8 }
  0x1e   :  { %49 = vadd.xlane.f32.xlu1 %v36_v10  ;;  %47 = vadd.xlane.f32.xlu0 %v35_v11 }
  0x22   :  { %53 = vadd.xlane.f32.xlu1 %v38_v14  ;;  %51 = vadd.xlane.f32.xlu0 %v37_v15 }
  0xa3   :  { %v44_v16 = vpop.xlane.xlu1 %43  ;;  %v40_v17 = vpop.xlane.xlu0 %39 }
  0xa4   :  { %v57_v18 = vmax.f32 %v44_v16, 1e-24  ;;  %v55_v19 = vmax.f32 %v40_v17, 1e-24 }
  0xa6   :  { %108 = vrsqrt.f32 %v57_v18 }
  0xa7   :  { %110 = vrsqrt.f32 %v55_v19  ;;  %v46_v20 = vpop.xlane.xlu1 %45  ;;  %v42_v21 = vpop.xlane.xlu0 %41 }
  0xa8   :  { %v58_v22 = vmax.f32 %v46_v20, 1e-24  ;;  %v56_v23 = vmax.f32 %v42_v21, 1e-24 }
  0xaa   :  { %112 = vrsqrt.f32 %v58_v22 }
  0xab   :  { %114 = vrsqrt.f32 %v56_v23  ;;  %v50_v24 = vpop.xlane.xlu1 %49  ;;  %v48_v25 = vpop.xlane.xlu0 %47 }
  0xac   :  { %v60_v26 = vmax.f32 %v50_v24, 1e-24  ;;  %v59_v27 = vmax.f32 %v48_v25, 1e-24 }
  0xae   :  { %116 = vrsqrt.f32 %v60_v26 }
  0xaf   :  { %118 = vrsqrt.f32 %v59_v27  ;;  %v54_v28 = vpop.xlane.xlu1 %53  ;;  %v52_v29 = vpop.xlane.xlu0 %51 }
  0xb0   :  { %v109_v30 = vpop.eup %108  ;;  %v62_v31 = vmax.f32 %v54_v28, 1e-24  ;;  %v61_v32 = vmax.f32 %v52_v29, 1e-24 }
  0xb1   :  { %v111_v33 = vpop.eup %110  ;;  %v73_v34 = vmul.f32 %v109_v30, %v25_v0 }
  0xb2   :  { %v71_v35 = vmul.f32 %v111_v33, %v23_v1  ;;  %120 = vrsqrt.f32 %v62_v31 }
  0xb3   :  { %81 = vst [vmem:[#allocation5 + $0x10] sm:$0xff] %v73_v34  ;;  %122 = vrsqrt.f32 %v61_v32 }
  0xb4   :  { %v113_v36 = vpop.eup %112  ;;  %79 = vst [vmem:[#allocation5] sm:$0xff] %v71_v35 }
  0xb5   :  { %v115_v37 = vpop.eup %114  ;;  %v74_v38 = vmul.f32 %v113_v36, %v26_v2 }
  0xb6   :  { %v72_v39 = vmul.f32 %v115_v37, %v24_v5 }
  0xb7   :  { %82 = vst [vmem:[#allocation5 + $0x18] sm:$0xff] %v74_v38 }
  0xb8   :  { %v117_v40 = vpop.eup %116  ;;  %80 = vst [vmem:[#allocation5 + $0x8] sm:$0xff] %v72_v39 }
  0xb9   :  { %v119_v41 = vpop.eup %118  ;;  %v76_v42 = vmul.f32 %v117_v40, %v28_v8 }
  0xba   :  { %v75_v43 = vmul.f32 %v119_v41, %v27_v9 }
  0xbb   :  { %84 = vst [vmem:[#allocation5 + $0x28] sm:$0xff] %v76_v42 }
  0xbc   :  { %v121_v44 = vpop.eup %120  ;;  %83 = vst [vmem:[#allocation5 + $0x20] sm:$0xff] %v75_v43 }
  0xbd   :  { %v123_v45 = vpop.eup %122  ;;  %v78_v46 = vmul.f32 %v121_v44, %v30_v12 }
  0xbe   :  { %v77_v47 = vmul.f32 %v123_v45, %v29_v13 }
  0xbf   :  { %86 = vst [vmem:[#allocation5 + $0x38] sm:$0xff] %v78_v46 }
  0xc0   :  { %85 = vst [vmem:[#allocation5 + $0x30] sm:$0xff] %v77_v47 }
  0xc1   :  { %157 = shalt.err (!%p154_p12)
}
  0xc2   :  { %s158_s24 = scalar_lea.hbm %s217_s1, 1024 }
  0xc3   :  { %p159_p13 = scmp.ne.s32.totalorder %s217_s1, %s158_s24  ;;  %p162_p0 = scmp.lt.u32.totalorder %s158_s24, %s217_s1 }
  0xc5   :  { %p164_p1 = pnand %p162_p0, %p159_p13 }
  0xc7   :  { %167 = shalt.err (!%p164_p1)
}
  0xc8   :  { %98 = dma.vmem_to_hbm [thread:$0]  %s93_s20, 1024, %s217_s1, [#allocation4], %s173_s16, %s173_s16, %s174_s17  }
  0xc9   :  { %170 = dma.done.wait [#allocation4], 1024  }
  0xca   :  { %171 = vsyncadd [#allocation4], 4294966272 }
  0xcb   :  { %102 = vsyncpa [#allocation3], 1 }
  0xcc   :  { %103 = vsyncpa [#allocation4], 1 }

</bundles_post_ra>
